<compile_context>
chip_gen: v7x
topology: tpu7x:2x2x1
jax: 0.10.0
libtpu: 0.0.40
codegen_flags: <defaults>
</compile_context>

<pallas_src>
import functools

import jax
import jax.numpy as jnp
from jax.experimental import pallas as pl
from jax.experimental.pallas import tpu as pltpu


SUBLANE = 8        # f32 sublane count
NEG_SLOPE = 0.01   # nn.LeakyReLU default negative slope


def _round_up(n, m):
    return ((n + m - 1) // m) * m


# ----------------------------- fused Pallas kernel --------------------------

def _fused_discriminator_kernel(*refs, n_x_solo, n_y_solo, n_post,
                                compute_dtype):
    """Entire FCDiscriminator forward for one batch tile.

    Ref layout (all VMEM, in order):
      x_ref, y_ref,
      (w, b) * n_x_solo,        # leading img_part blocks run on x alone
      (w, b) * n_y_solo,        # leading y_part blocks run on y alone
      w_mx, w_my, b_m,          # merge layer: concat folded into a row split
      (w, b) * n_post,          # packed branch layers + joint layers
      out_ref                   # (tb, out_dim)
    """
    pos = 0
    x_ref, y_ref = refs[0], refs[1]
    pos = 2

    def take(n):
        nonlocal pos
        lst = [(refs[pos + 2 * i], refs[pos + 2 * i + 1]) for i in range(n)]
        pos += 2 * n
        return lst

    x_solo = take(n_x_solo)
    y_solo = take(n_y_solo)
    wmx_ref, wmy_ref, bm_ref = refs[pos], refs[pos + 1], refs[pos + 2]
    pos += 3
    post = take(n_post)
    out_ref = refs[pos]

    def dot(a, w_ref):
        # bf16 MXU operands, f32 accumulation.
        return jnp.dot(a.astype(compute_dtype),
                       w_ref[...].astype(compute_dtype),
                       preferred_element_type=jnp.float32)

    def act(z, kind):
        if kind == "sigmoid":
            # Exact f32 sigmoid (exp routes to the EUP).
            return 1.0 / (1.0 + jnp.exp(-z))
        return jnp.where(z >= 0, z, NEG_SLOPE * z)

    # Branch stacks (Dropout is identity in eval mode).
    h = x_ref[...]
    for (w, b) in x_solo:
        h = act(dot(h, w) + b[...], "leaky")
    g = y_ref[...]
    for (w, b) in y_solo:
        g = act(dot(g, w) + b[...], "leaky")

    # Merge layer: concat([h, g]) @ W  ==  h @ W_x + g @ W_y  (cat folded away).
    z = dot(h, wmx_ref) + dot(g, wmy_ref) + bm_ref[...]
    j = act(z, "sigmoid" if n_post == 0 else "leaky")

    # Remaining (block-diag packed branch + joint) layers; last is sigmoid.
    for idx, (w, b) in enumerate(post):
        j = act(dot(j, w) + b[...],
                "sigmoid" if idx == n_post - 1 else "leaky")

    out_ref[...] = j.astype(out_ref.dtype)


# ------------------------- one-time parameter packing -----------------------

def _block_diag(wa, wb):
    ia, oa = wa.shape
    ib, ob = wb.shape
    top = jnp.concatenate([wa, jnp.zeros((ia, ob), wa.dtype)], axis=1)
    bot = jnp.concatenate([jnp.zeros((ib, oa), wb.dtype), wb], axis=1)
    return jnp.concatenate([top, bot], axis=0)


def prepare_params(params, d_x_in, d_y_in, *, weight_dtype=jnp.bfloat16):
    """One-time re-packing of (img, y, joint) Linear params.

    params = (img_params, y_params, joint_params); each a list of (w, b) with
    w shaped (in_dim, out_dim) (= PyTorch weight.T).  Returns
    (x_solo, y_solo, merge, post) where merge = (w_x, w_y, b).
    """
    img_params, y_params, joint_params = params
    assert len(joint_params) >= 1

    n_i, n_y = len(img_params), len(y_params)
    n_pack = min(n_i, n_y)          # trailing branch layers that get packed

    wcast = lambda w: jnp.asarray(w, weight_dtype)
    bvec = lambda b: jnp.asarray(b, jnp.float32).reshape(1, -1)

    x_solo = [(wcast(w), bvec(b)) for (w, b) in img_params[: n_i - n_pack]]
    y_solo = [(wcast(w), bvec(b)) for (w, b) in y_params[: n_y - n_pack]]

    d_x_out = img_params[-1][0].shape[1] if n_i else d_x_in
    d_y_out = y_params[-1][0].shape[1] if n_y else d_y_in
    assert joint_params[0][0].shape[0] == d_x_out + d_y_out

    post = []
    if n_pack >= 1:
        # Merge at the first packed branch layer (row-split of the block-diag).
        wi, bi = img_params[n_i - n_pack]
        wy, by = y_params[n_y - n_pack]
        oi, oy = wi.shape[1], wy.shape[1]
        w_x = jnp.concatenate([wi, jnp.zeros((wi.shape[0], oy), wi.dtype)], 1)
        w_y = jnp.concatenate([jnp.zeros((wy.shape[0], oi), wy.dtype), wy], 1)
        merge = (wcast(w_x), wcast(w_y),
                 bvec(jnp.concatenate([jnp.asarray(bi), jnp.asarray(by)])))
        # Remaining branch layers: block-diagonal packed (single wide dot each).
        for k in range(1, n_pack):
            wi, bi = img_params[n_i - n_pack + k]
            wy, by = y_params[n_y - n_pack + k]
            post.append((wcast(_block_diag(jnp.asarray(wi), jnp.asarray(wy))),
                         bvec(jnp.concatenate([jnp.asarray(bi),
                                               jnp.asarray(by)]))))
        post += [(wcast(w), bvec(b)) for (w, b) in joint_params]
    else:
        # One branch has no layers: the first joint layer does the merge.
        wj0, bj0 = joint_params[0]
        merge = (wcast(wj0[:d_x_out, :]), wcast(wj0[d_x_out:, :]), bvec(bj0))
        post = [(wcast(w), bvec(b)) for (w, b) in joint_params[1:]]

    return x_solo, y_solo, merge, post


# ------------------------------- fused forward -------------------------------

def fc_discriminator_forward(prepared, x, y, *, tb_target=1024,
                             compute_dtype=jnp.bfloat16):
    """Fused forward. `prepared` comes from prepare_params (call it once)."""
    x_solo, y_solo, (w_mx, w_my, b_m), post = prepared

    batch, d_x = x.shape
    batch_y, d_y = y.shape
    assert batch == batch_y
    out_dim = post[-1][0].shape[1] if post else w_mx.shape[1]

    # Batch tiling: big tiles, >= 2 grid steps when possible (v7x has two
    # TensorCores), and a padded tail smaller than one tile (usually zero).
    if batch <= SUBLANE:
        tb, b_pad = batch, batch
    else:
        steps = max(2, -(-batch // tb_target))
        tb = _round_up(-(-batch // steps), SUBLANE)
        b_pad = _round_up(batch, tb)
    if b_pad != batch:  # rows-only pad; feature dims are never padded in HBM
        x = jnp.pad(x, ((0, b_pad - batch), (0, 0)))
        y = jnp.pad(y, ((0, b_pad - batch), (0, 0)))

    operands = [x, y]
    for (w, b) in x_solo:
        operands += [w, b]
    for (w, b) in y_solo:
        operands += [w, b]
    operands += [w_mx, w_my, b_m]
    for (w, b) in post:
        operands += [w, b]

    kernel = functools.partial(
        _fused_discriminator_kernel,
        n_x_solo=len(x_solo), n_y_solo=len(y_solo), n_post=len(post),
        compute_dtype=compute_dtype,
    )

    def stream_spec(d):               # batch-streamed input, natural width
        return pl.BlockSpec((tb, d), lambda i: (i, 0))

    def resident_spec(arr):           # constant index map -> fetched once
        return pl.BlockSpec(arr.shape, lambda i: (0, 0))

    in_specs = ([stream_spec(d_x), stream_spec(d_y)]
                + [resident_spec(a) for a in operands[2:]])
    out_specs = pl.BlockSpec((tb, out_dim), lambda i: (i, 0))

    # Scoped-VMEM estimate: only override the (16 MiB on v5e) default if the
    # double-buffered streams / resident weights / live activations need it.
    widths = [d_x, d_y, w_mx.shape[1]] + [w.shape[1] for (w, _) in
                                          x_solo + y_solo + post]
    est = 2 * tb * (d_x * x.dtype.itemsize + d_y * y.dtype.itemsize
                    + out_dim * 4)
    est += 2 * sum(a.size * a.dtype.itemsize for a in operands[2:])
    est += 6 * tb * max(widths) * 4
    cp_kwargs = dict(dimension_semantics=("parallel",))
    if est > 16 * 1024 * 1024:
        cp_kwargs["vmem_limit_bytes"] = min(int(est * 1.25), 64 * 1024 * 1024)

    out = pl.pallas_call(
        kernel,
        out_shape=jax.ShapeDtypeStruct((b_pad, out_dim), jnp.float32),
        grid=(b_pad // tb,),
        in_specs=in_specs,
        out_specs=out_specs,
        compiler_params=pltpu.CompilerParams(**cp_kwargs),
    )(*operands)

    return out[:batch] if b_pad != batch else out


# ------------------------- parameter construction ---------------------------

def init_linear_params(key, in_dim, out_dim):
    """Init mimicking nn.Linear's uniform(-1/sqrt(in), 1/sqrt(in))."""
    kw, kb = jax.random.split(key)
    bound = 1.0 / jnp.sqrt(jnp.float32(in_dim))
    # weight stored (in_dim, out_dim) == PyTorch weight.T
    w = jax.random.uniform(kw, (in_dim, out_dim), jnp.float32, -bound, bound)
    b = jax.random.uniform(kb, (out_dim,), jnp.float32, -bound, bound)
    return w, b


def init_fc_stack(key, dims):
    params = []
    for i in range(len(dims) - 1):
        key, sub = jax.random.split(key)
        params.append(init_linear_params(sub, dims[i], dims[i + 1]))
    return params


# -------------------------- pure-JAX reference ------------------------------

def _reference_forward(params, x, y):
    img_params, y_params, joint_params = params

    def block(a, w, b, a_type):
        z = a @ w + b
        if a_type == "sigmoid":
            return jax.nn.sigmoid(z)
        return jnp.where(z >= 0, z, NEG_SLOPE * z)

    for (w, b) in img_params:
        x = block(x, w, b, "leaky")
    for (w, b) in y_params:
        y = block(y, w, b, "leaky")
    j = jnp.concatenate((x, y), axis=1)
    for idx, (w, b) in enumerate(joint_params):
        a_type = "sigmoid" if idx == len(joint_params) - 1 else "leaky"
        j = block(j, w, b, a_type)
    return j


# ----------------------------------- main -----------------------------------

if __name__ == "__main__":
    # Small synthetic config (matching the module's construction logic):
    #   dis_z_fcs = [16, 32, 32]   (img_part: 2 blocks)
    #   dis_y_fcs = [8, 16]        (y_part:   1 block)
    #   dis_j_fcs = [48, 32, 1]    (joint: 1 LeakyReLU block + 1 sigmoid block)
    dis_z_fcs = [16, 32, 32]
    dis_y_fcs = [8, 16]
    dis_j_fcs = [dis_z_fcs[-1] + dis_y_fcs[-1], 32, 1]
    batch = 32   # small, but enough to exercise a 2-step batch grid

    key = jax.random.PRNGKey(0)
    k_img, k_y, k_j, k_x, k_yin = jax.random.split(key, 5)

    params = (
        init_fc_stack(k_img, dis_z_fcs),
        init_fc_stack(k_y, dis_y_fcs),
        init_fc_stack(k_j, dis_j_fcs),
    )

    x = jax.random.normal(k_x, (batch, dis_z_fcs[0]), jnp.float32)
    y = jax.random.normal(k_yin, (batch, dis_y_fcs[0]), jnp.float32)

    prepared = prepare_params(params, dis_z_fcs[0], dis_y_fcs[0])

    out = fc_discriminator_forward(prepared, x, y)
    out = jax.block_until_ready(out)

    assert out.shape == (batch, dis_j_fcs[-1]), out.shape
    assert bool(jnp.all((out >= 0.0) & (out <= 1.0))), "sigmoid output range"

    # Correctness vs f32 reference (loose tol: bf16 MXU operands in kernel).
    ref = jax.block_until_ready(_reference_forward(params, x, y))
    assert bool(jnp.all(jnp.abs(out - ref) < 5e-2)), \
        float(jnp.max(jnp.abs(out - ref)))

    print("KERNEL_OK")
</pallas_src>

<mosaic_0001>
module attributes {stable_mosaic.version = 11 : i64} {
  func.func @_fused_discriminator_kernel(%arg0: i32, %arg1: memref<16x16xf32, #tpu.memory_space<vmem>>, %arg2: memref<16x8xf32, #tpu.memory_space<vmem>>, %arg3: memref<16x32xbf16, #tpu.memory_space<vmem>>, %arg4: memref<1x32xf32, #tpu.memory_space<vmem>>, %arg5: memref<32x48xbf16, #tpu.memory_space<vmem>>, %arg6: memref<8x48xbf16, #tpu.memory_space<vmem>>, %arg7: memref<1x48xf32, #tpu.memory_space<vmem>>, %arg8: memref<48x32xbf16, #tpu.memory_space<vmem>>, %arg9: memref<1x32xf32, #tpu.memory_space<vmem>>, %arg10: memref<32x1xbf16, #tpu.memory_space<vmem>>, %arg11: memref<1x1xf32, #tpu.memory_space<vmem>>, %arg12: memref<16x1xf32, #tpu.memory_space<vmem>>) attributes {dimension_semantics = [#tpu.dimension_semantics<parallel>], iteration_bounds = array<i64: 2>, scalar_prefetch = 0 : i64, scratch_operands = 0 : i64, tpu.core_type = #tpu.core_type<tc>, window_params = [{transform_indices = @transform_0, window_bounds = array<i64: 16, 16>}, {transform_indices = @transform_1, window_bounds = array<i64: 16, 8>}, {pipeline_mode = #tpu.pipeline_mode<synchronous>, transform_indices = @transform_2, window_bounds = array<i64: 16, 32>}, {pipeline_mode = #tpu.pipeline_mode<synchronous>, transform_indices = @transform_3, window_bounds = array<i64: 1, 32>}, {pipeline_mode = #tpu.pipeline_mode<synchronous>, transform_indices = @transform_4, window_bounds = array<i64: 32, 48>}, {pipeline_mode = #tpu.pipeline_mode<synchronous>, transform_indices = @transform_5, window_bounds = array<i64: 8, 48>}, {pipeline_mode = #tpu.pipeline_mode<synchronous>, transform_indices = @transform_6, window_bounds = array<i64: 1, 48>}, {pipeline_mode = #tpu.pipeline_mode<synchronous>, transform_indices = @transform_7, window_bounds = array<i64: 48, 32>}, {pipeline_mode = #tpu.pipeline_mode<synchronous>, transform_indices = @transform_8, window_bounds = array<i64: 1, 32>}, {pipeline_mode = #tpu.pipeline_mode<synchronous>, transform_indices = @transform_9, window_bounds = array<i64: 32, 1>}, {pipeline_mode = #tpu.pipeline_mode<synchronous>, transform_indices = @transform_10, window_bounds = array<i64: 1, 1>}, {transform_indices = @transform_11, window_bounds = array<i64: 16, 1>}]} {
    %c0 = arith.constant 0 : index
    %c0_0 = arith.constant 0 : index
    %0 = vector.load %arg1[%c0, %c0_0] : memref<16x16xf32, #tpu.memory_space<vmem>>, vector<16x16xf32>
    %1 = arith.truncf %0 : vector<16x16xf32> to vector<16x16xbf16>
    %c0_1 = arith.constant 0 : index
    %c0_2 = arith.constant 0 : index
    %2 = vector.load %arg3[%c0_1, %c0_2] : memref<16x32xbf16, #tpu.memory_space<vmem>>, vector<16x32xbf16>
    %cst = arith.constant dense<0.000000e+00> : vector<16x32xf32>
    %3 = tpu.matmul %1, %2, %cst {dimension_numbers = #tpu.dot_dimension_numbers<[1], [0], [0], [1], [0, 0, 1, 1], [], []>} : vector<16x16xbf16>, vector<16x32xbf16>, vector<16x32xf32> -> vector<16x32xf32>
    %c0_3 = arith.constant 0 : index
    %c0_4 = arith.constant 0 : index
    %4 = vector.load %arg4[%c0_3, %c0_4] : memref<1x32xf32, #tpu.memory_space<vmem>>, vector<1x32xf32>
    %5 = vector.broadcast %4 : vector<1x32xf32> to vector<16x32xf32>
    %6 = arith.addf %3, %5 : vector<16x32xf32>
    %cst_5 = arith.constant 0.000000e+00 : f32
    %7 = vector.broadcast %cst_5 : f32 to vector<16x32xf32>
    %8 = arith.cmpf oge, %6, %7 : vector<16x32xf32>
    %cst_6 = arith.constant 0.00999999977 : f32
    %9 = vector.broadcast %cst_6 : f32 to vector<16x32xf32>
    %10 = arith.mulf %9, %6 : vector<16x32xf32>
    %11 = arith.select %8, %6, %10 : vector<16x32xi1>, vector<16x32xf32>
    %c0_7 = arith.constant 0 : index
    %c0_8 = arith.constant 0 : index
    %12 = vector.load %arg2[%c0_7, %c0_8] : memref<16x8xf32, #tpu.memory_space<vmem>>, vector<16x8xf32>
    %13 = arith.truncf %11 : vector<16x32xf32> to vector<16x32xbf16>
    %c0_9 = arith.constant 0 : index
    %c0_10 = arith.constant 0 : index
    %14 = vector.load %arg5[%c0_9, %c0_10] : memref<32x48xbf16, #tpu.memory_space<vmem>>, vector<32x48xbf16>
    %cst_11 = arith.constant dense<0.000000e+00> : vector<16x48xf32>
    %15 = tpu.matmul %13, %14, %cst_11 {dimension_numbers = #tpu.dot_dimension_numbers<[1], [0], [0], [1], [0, 0, 1, 1], [], []>} : vector<16x32xbf16>, vector<32x48xbf16>, vector<16x48xf32> -> vector<16x48xf32>
    %16 = arith.truncf %12 : vector<16x8xf32> to vector<16x8xbf16>
    %c0_12 = arith.constant 0 : index
    %c0_13 = arith.constant 0 : index
    %17 = vector.load %arg6[%c0_12, %c0_13] : memref<8x48xbf16, #tpu.memory_space<vmem>>, vector<8x48xbf16>
    %cst_14 = arith.constant dense<0.000000e+00> : vector<16x48xf32>
    %18 = tpu.matmul %16, %17, %cst_14 {dimension_numbers = #tpu.dot_dimension_numbers<[1], [0], [0], [1], [0, 0, 1, 1], [], []>} : vector<16x8xbf16>, vector<8x48xbf16>, vector<16x48xf32> -> vector<16x48xf32>
    %19 = arith.addf %15, %18 : vector<16x48xf32>
    %c0_15 = arith.constant 0 : index
    %c0_16 = arith.constant 0 : index
    %20 = vector.load %arg7[%c0_15, %c0_16] : memref<1x48xf32, #tpu.memory_space<vmem>>, vector<1x48xf32>
    %21 = vector.broadcast %20 : vector<1x48xf32> to vector<16x48xf32>
    %22 = arith.addf %19, %21 : vector<16x48xf32>
    %cst_17 = arith.constant 0.000000e+00 : f32
    %23 = vector.broadcast %cst_17 : f32 to vector<16x48xf32>
    %24 = arith.cmpf oge, %22, %23 : vector<16x48xf32>
    %cst_18 = arith.constant 0.00999999977 : f32
    %25 = vector.broadcast %cst_18 : f32 to vector<16x48xf32>
    %26 = arith.mulf %25, %22 : vector<16x48xf32>
    %27 = arith.select %24, %22, %26 : vector<16x48xi1>, vector<16x48xf32>
    %28 = arith.truncf %27 : vector<16x48xf32> to vector<16x48xbf16>
    %c0_19 = arith.constant 0 : index
    %c0_20 = arith.constant 0 : index
    %29 = vector.load %arg8[%c0_19, %c0_20] : memref<48x32xbf16, #tpu.memory_space<vmem>>, vector<48x32xbf16>
    %cst_21 = arith.constant dense<0.000000e+00> : vector<16x32xf32>
    %30 = tpu.matmul %28, %29, %cst_21 {dimension_numbers = #tpu.dot_dimension_numbers<[1], [0], [0], [1], [0, 0, 1, 1], [], []>} : vector<16x48xbf16>, vector<48x32xbf16>, vector<16x32xf32> -> vector<16x32xf32>
    %c0_22 = arith.constant 0 : index
    %c0_23 = arith.constant 0 : index
    %31 = vector.load %arg9[%c0_22, %c0_23] : memref<1x32xf32, #tpu.memory_space<vmem>>, vector<1x32xf32>
    %32 = vector.broadcast %31 : vector<1x32xf32> to vector<16x32xf32>
    %33 = arith.addf %30, %32 : vector<16x32xf32>
    %cst_24 = arith.constant 0.000000e+00 : f32
    %34 = vector.broadcast %cst_24 : f32 to vector<16x32xf32>
    %35 = arith.cmpf oge, %33, %34 : vector<16x32xf32>
    %cst_25 = arith.constant 0.00999999977 : f32
    %36 = vector.broadcast %cst_25 : f32 to vector<16x32xf32>
    %37 = arith.mulf %36, %33 : vector<16x32xf32>
    %38 = arith.select %35, %33, %37 : vector<16x32xi1>, vector<16x32xf32>
    %39 = arith.truncf %38 : vector<16x32xf32> to vector<16x32xbf16>
    %c0_26 = arith.constant 0 : index
    %c0_27 = arith.constant 0 : index
    %40 = vector.load %arg10[%c0_26, %c0_27] : memref<32x1xbf16, #tpu.memory_space<vmem>>, vector<32x1xbf16>
    %cst_28 = arith.constant dense<0.000000e+00> : vector<16x1xf32>
    %41 = tpu.matmul %39, %40, %cst_28 {dimension_numbers = #tpu.dot_dimension_numbers<[1], [0], [0], [1], [0, 0, 1, 1], [], []>} : vector<16x32xbf16>, vector<32x1xbf16>, vector<16x1xf32> -> vector<16x1xf32>
    %c0_29 = arith.constant 0 : index
    %c0_30 = arith.constant 0 : index
    %42 = vector.load %arg11[%c0_29, %c0_30] : memref<1x1xf32, #tpu.memory_space<vmem>>, vector<1x1xf32>
    %43 = vector.broadcast %42 : vector<1x1xf32> to vector<16x1xf32>
    %44 = arith.addf %41, %43 : vector<16x1xf32>
    %cst_31 = arith.constant 0.000000e+00 : f32
    %45 = vector.broadcast %cst_31 : f32 to vector<16x1xf32>
    %46 = arith.subf %45, %44 : vector<16x1xf32>
    %47 = math.exp %46 : vector<16x1xf32>
    %cst_32 = arith.constant 1.000000e+00 : f32
    %48 = vector.broadcast %cst_32 : f32 to vector<16x1xf32>
    %49 = arith.addf %48, %47 : vector<16x1xf32>
    %cst_33 = arith.constant 1.000000e+00 : f32
    %50 = vector.broadcast %cst_33 : f32 to vector<16x1xf32>
    %51 = arith.divf %50, %49 : vector<16x1xf32>
    %c0_34 = arith.constant 0 : index
    %c0_35 = arith.constant 0 : index
    %52 = vector.load %arg12[%c0_34, %c0_35] : memref<16x1xf32, #tpu.memory_space<vmem>>, vector<16x1xf32>
    tpu.vector_store %arg12[%c0_34, %c0_35], %51 {strides = array<i32>} : memref<16x1xf32, #tpu.memory_space<vmem>>, vector<16x1xf32>,
    return
  }
  func.func @transform_0(%arg0: i32) -> (i32, i32) {
    %c0_i32 = arith.constant 0 : i32
    %c0_i32_0 = arith.constant 0 : i32
    return %arg0, %c0_i32 : i32, i32
  }
  func.func @transform_1(%arg0: i32) -> (i32, i32) {
    %c0_i32 = arith.constant 0 : i32
    %c0_i32_0 = arith.constant 0 : i32
    return %arg0, %c0_i32 : i32, i32
  }
  func.func @transform_2(%arg0: i32) -> (i32, i32) {
    %c0_i32 = arith.constant 0 : i32
    %c0_i32_0 = arith.constant 0 : i32
    %c0_i32_1 = arith.constant 0 : i32
    return %c0_i32, %c0_i32_0 : i32, i32
  }
  func.func @transform_3(%arg0: i32) -> (i32, i32) {
    %c0_i32 = arith.constant 0 : i32
    %c0_i32_0 = arith.constant 0 : i32
    %c0_i32_1 = arith.constant 0 : i32
    return %c0_i32, %c0_i32_0 : i32, i32
  }
  func.func @transform_4(%arg0: i32) -> (i32, i32) {
    %c0_i32 = arith.constant 0 : i32
    %c0_i32_0 = arith.constant 0 : i32
    %c0_i32_1 = arith.constant 0 : i32
    return %c0_i32, %c0_i32_0 : i32, i32
  }
  func.func @transform_5(%arg0: i32) -> (i32, i32) {
    %c0_i32 = arith.constant 0 : i32
    %c0_i32_0 = arith.constant 0 : i32
    %c0_i32_1 = arith.constant 0 : i32
    return %c0_i32, %c0_i32_0 : i32, i32
  }
  func.func @transform_6(%arg0: i32) -> (i32, i32) {
    %c0_i32 = arith.constant 0 : i32
    %c0_i32_0 = arith.constant 0 : i32
    %c0_i32_1 = arith.constant 0 : i32
    return %c0_i32, %c0_i32_0 : i32, i32
  }
  func.func @transform_7(%arg0: i32) -> (i32, i32) {
    %c0_i32 = arith.constant 0 : i32
    %c0_i32_0 = arith.constant 0 : i32
    %c0_i32_1 = arith.constant 0 : i32
    return %c0_i32, %c0_i32_0 : i32, i32
  }
  func.func @transform_8(%arg0: i32) -> (i32, i32) {
    %c0_i32 = arith.constant 0 : i32
    %c0_i32_0 = arith.constant 0 : i32
    %c0_i32_1 = arith.constant 0 : i32
    return %c0_i32, %c0_i32_0 : i32, i32
  }
  func.func @transform_9(%arg0: i32) -> (i32, i32) {
    %c0_i32 = arith.constant 0 : i32
    %c0_i32_0 = arith.constant 0 : i32
    %c0_i32_1 = arith.constant 0 : i32
    return %c0_i32, %c0_i32_0 : i32, i32
  }
  func.func @transform_10(%arg0: i32) -> (i32, i32) {
    %c0_i32 = arith.constant 0 : i32
    %c0_i32_0 = arith.constant 0 : i32
    %c0_i32_1 = arith.constant 0 : i32
    return %c0_i32, %c0_i32_0 : i32, i32
  }
  func.func @transform_11(%arg0: i32) -> (i32, i32) {
    %c0_i32 = arith.constant 0 : i32
    %c0_i32_0 = arith.constant 0 : i32
    return %arg0, %c0_i32 : i32, i32
  }
}

</mosaic_0001>

<bundles_post_ra>
// kernel: tpu_custom_call.1
= control target key start
LH: loop header
LB: loop body
LE: loop exit
PB: predicated region body
PF: predicated region fallthrough
CT: control target
= control target key end

     0   :  { %s1029_s19 = smov 0   ;;  %s1111_s0 = inlined_call_operand.vmem [shape: f32[32,16], index: 0, kind: input, shape index: {}]   ;;  %s1112_s1 = inlined_call_operand.vmem [shape: f32[32,8], index: 1, kind: input, shape index: {}]   ;;  %s1113_s2 = inlined_call_operand.vmem [shape: bf16[16,32], index: 2, kind: input, shape index: {}]   ;;  %s1114_s3 = inlined_call_operand.vmem [shape: f32[1,32], index: 3, kind: input, shape index: {}]   ;;  %s1115_s4 = inlined_call_operand.vmem [shape: bf16[32,48], index: 4, kind: input, shape index: {}]   ;;  %s1116_s5 = inlined_call_operand.vmem [shape: bf16[8,48], index: 5, kind: input, shape index: {}]   ;;  %s1117_s6 = inlined_call_operand.vmem [shape: f32[1,48], index: 6, kind: input, shape index: {}]   ;;  %s1118_s7 = inlined_call_operand.vmem [shape: bf16[48,32], index: 7, kind: input, shape index: {}]   ;;  %s1119_s8 = inlined_call_operand.vmem [shape: f32[1,32], index: 8, kind: input, shape index: {}]   ;;  %s1120_s9 = inlined_call_operand.vmem [shape: bf16[32,1], index: 9, kind: input, shape index: {}]   ;;  %s1121_s10 = inlined_call_operand.<no memory space> [shape: f32[1,1], index: 10, kind: input, shape index: {}]   ;;  %s1122_s11 = inlined_call_operand.vmem [shape: f32[32,1], index: 11, kind: output, shape index: {}]  }
   0x1   :  { %v16_v0 = vstv %s1121_s10 }
   0x2   :  { %17 = vst [vmem:[#allocation2] sm:$0x1] %v16_v0 }
   0x3 LB: > { %s848_s20 = sadd.s32 4294967295, %s962_s19   ;;  %p852_p0 = scmp.ge.s32.totalorder %s962_s19, 1  ;;  %s962_s19 = sphi %s1029_s19, %s23_s19  }
   0x4   : > { %p351_p1 = scmp.lt.s32.totalorder %s962_s19, 3 }
   0x6   : > { %p352_p2 = pnand %p852_p0, %p351_p1 }
   0x7   : > { %v940_v1 = vld [vmem:[%s1113_s2] sm:$0xff] (!%p352_p2)   ;;  %v964_v2 = vmov (!%p352_p2), 0.0   ;;  %s853_s10 = sshll.u32 (!%p352_p2), %s848_s20, 1  ;;  %vm965_vm0 = vmmov (!%p352_p2), 0   ;;  %vm433_vm1 = vcmask (!%p352_p2), 130048   ;;  %vm497_vm2 = vcmask (!%p352_p2), 1043456  }
   0x8   : > { %355 = sbr.rel (%p352_p2) target bundleno = 931 (0x3a3), region = 64  ;;  %892 = vmatprep.subr.bf16.mxu0 (!%p352_p2), %v964_v2  ;;  %898 = vmatprep.subr.bf16.mxu1 (!%p352_p2), %v964_v2  ;;  %p397_p3 = scmp.lt.s32.totalorder (!%p352_p2), %s853_s10, 3  ;;  %v941_v6 = vld [vmem:[%s1115_s4] sm:$0xff] (!%p352_p2)   ;;  %v942_v11 = vld [vmem:[%s1115_s4 + $0x8] sm:$0xff] (!%p352_p2)   ;;  %vm493_vm3 = vcmask (!%p352_p2), 64512   ;;  %vm554_vm6 = vcmask (!%p352_p2), 261120  }
   0x9   : > { %893 = vmatpush3.bf16.msra.mxu0 (!%p352_p2), %v940_v1  ;;  %894 = vmatprep.mubr.msk.bf16.mxu0 (!%p352_p2), %vm965_vm0, %v964_v2  ;;  %v492_v7 = vld [vmem:[%s1116_s5] sm:$0xf] (!%p352_p2)  ;;  %v944_v30 = vld [vmem:[%s1118_s7 + $0x8] sm:$0xff] (!%p352_p2)   ;;  %v945_v31 = vld [vmem:[%s1118_s7 + $0x10] sm:$0xff] (!%p352_p2)   ;;  %vm646_vm9 = vcmask (!%p352_p2), 392192   ;;  %vm777_vm12 = vcmask (!%p352_p2), 7168  }
   0xa   : > { %904 = vmatprep.subr.bf16.mxu0 (!%p352_p2), %v964_v2  ;;  %900 = vmatprep.mubr.msk.bf16.mxu1 (!%p352_p2), %vm965_vm0, %v964_v2  ;;  %v499_v8 = vsel (!%p352_p2), %vm497_vm2, %v492_v7, 0  ;;  %v859_v13 = vld [vmem:[%s1114_s3] ss:$0 sm:$0xff] (!%p352_p2)  ;;  %v947_v47 = vld [vmem:[%s1120_s9 + $0x8] sm:$0xff] (!%p352_p2)  }
   0xb   : > { %899 = vmatpush3.bf16.msra.mxu1 (!%p352_p2), %v499_v8  ;;  %v943_v28 = vld [vmem:[%s1118_s7] sm:$0xff] (!%p352_p2)  }
   0xc   : > { %912 = vmatprep.subr.bf16.mxu1 (!%p352_p2), %v964_v2  ;;  %v866_v33 = vld [vmem:[%s1117_s6] ss:$0 sm:$0xff] (!%p352_p2) }
   0xd   : > { %v946_v46 = vld [vmem:[%s1120_s9] sm:$0xff] (!%p352_p2)  }
   0xe   : > { %v867_v48 = vld [vmem:[%s1119_s8] ss:$0 sm:$0xff] (!%p352_p2) }
   0xf   : > { %s1124_s10 = smov (!%p397_p3, %s853_s10), 3  ;;  %v872_v60 = vld [vmem:[#allocation2] ss:$0 sm:$0xff] }
  0x10   : > { %s1047_s23 = sshll.u32 %s1124_s10, 3 }
  0x11   : > { %s400_s26 = scalar_lea.vmem %s1111_s0, %s1047_s23  ;;  %s406_s14 = scalar_lea.vmem %s1112_s1, %s1047_s23 }
  0x12   : > { %v415_v3 = vld [vmem:[%s400_s26] sm:$0xff]  ;;  %v416_v4 = vld [vmem:[%s400_s26 + $0x8] sm:$0xff]  ;;  %s412_s17 = scalar_lea.vmem %s1122_s11, %s1047_s23 }
  0x13   : > { %v417_v5 = vpack.c.bf16 %v416_v4, %v415_v3  ;;  %v484_v9 = vld [vmem:[%s406_s14] sm:$0xff]  ;;  %v485_v10 = vld [vmem:[%s406_s14 + $0x8] sm:$0xff] }
  0x14   : > { %v491_v12 = vpack.c.bf16 %v485_v10, %v484_v9 }
  0x15   : > { %895 = vmatmul.mubr.msk.bf16.vlgmr.msra.gmra.mrb[0].mxu0 %vm433_vm1, %v417_v5 }
  0x16   : > { %908 = vmatprep.mubr.msk.bf16.mxu0 %vm965_vm0, %v964_v2  ;;  %905 = vmatpush3.bf16.msra.mxu0 %v941_v6 }
  0x17   : > { %906 = vmatprep.subr.bf16.mxu0 %v964_v2  ;;  %901 = vmatmul.mubr.msk.bf16.vlgmr.msra.gmra.mrb[0].mxu1 %vm493_vm3, %v491_v12 }
  0x18   : > { %918 = vmatprep.mubr.msk.bf16.mxu1 %vm965_vm0, %v964_v2  ;;  %913 = vmatpush3.bf16.msra.mxu1 %v943_v28 }
  0x19   : > { %914 = vmatprep.subr.bf16.mxu1 %v964_v2 }
  0x1a   : > { %907 = vmatpush3.bf16.msra.mxu0 %v942_v11 }
  0x1b   : > { %922 = vmatprep.subr.bf16.mxu0 %v964_v2 }
  0x1c   : > { %915 = vmatpush3.bf16.msra.mxu1 %v944_v30 }
  0x1d   : > { %916 = vmatprep.subr.bf16.mxu1 %v964_v2 }
  0x20   : > { %917 = vmatpush3.bf16.msra.mxu1 %v945_v31 }
  0xe8   : > { %v471_v14 = vpop.f32.mrb[0].mxu0 }
  0xe9   : > { %v472_v15 = vadd.f32 %v859_v13, %v471_v14  ;;  %v896_v16 = vpop.f32.mrb[1].mxu0 }
  0xea   : > { %v474_v17 = vpop.f32.mrb[2].mxu0  ;;  %v535_v25 = vpop.f32.mrb[0].mxu1 }
  0xeb   : > { %v480_v18 = vmul.f32 0.01, %v472_v15  ;;  %v475_v19 = vadd.f32 %v859_v13, %v474_v17  ;;  %v897_v20 = vpop.f32.mrb[3].mxu0  ;;  %vm478_vm4 = vcmp.ge.f32.partialorder %v472_v15, 0.0  ;;  %v902_v26 = vpop.f32.mrb[1].mxu1 }
  0xec   : > { %v538_v27 = vpop.f32.mrb[2].mxu1 }
  0xed   : > { %vm479_vm5 = vcmp.ge.f32.partialorder %v475_v19, 0.0  ;;  %v481_v21 = vmul.f32 0.01, %v475_v19  ;;  %v482_v22 = vsel %vm478_vm4, %v472_v15, %v480_v18  ;;  %v903_v29 = vpop.f32.mrb[3].mxu1 }
  0xef   : > { %v483_v23 = vsel %vm479_vm5, %v475_v19, %v481_v21 }
  0xf0   : > { %v486_v24 = vpack.c.bf16 %v483_v23, %v482_v22 }
  0xf2   : > { %909 = vmatmul.mubr.msk.bf16.vlgmr.msra.gmra.mrb[4].mxu0 %vm554_vm6, %v486_v24 }
  0xf3   : > { %926 = vmatprep.mubr.msk.bf16.mxu0 %vm965_vm0, %v964_v2  ;;  %923 = vmatpush3.bf16.msra.mxu0 %v946_v46 }
  0xf4   : > { %924 = vmatprep.subr.bf16.mxu0 %v964_v2 }
  0xf7   : > { %925 = vmatpush3.bf16.msra.mxu0 %v947_v47 }
 0x1c5   : > { %v592_v32 = vpop.f32.mrb[4].mxu0 }
 0x1c6   : > { %v593_v34 = vadd.f32 %v592_v32, %v535_v25  ;;  %v910_v35 = vpop.f32.mrb[5].mxu0 }
 0x1c7   : > { %v595_v36 = vpop.f32.mrb[6].mxu0 }
 0x1c8   : > { %v606_v37 = vadd.f32 %v866_v33, %v593_v34  ;;  %v596_v38 = vadd.f32 %v595_v36, %v538_v27  ;;  %v911_v39 = vpop.f32.mrb[7].mxu0 }
 0x1ca   : > { %v610_v40 = vmul.f32 0.01, %v606_v37  ;;  %v607_v41 = vadd.f32 %v866_v33, %v596_v38  ;;  %vm608_vm7 = vcmp.ge.f32.partialorder %v606_v37, 0.0 }
 0x1cc   : > { %vm609_vm8 = vcmp.ge.f32.partialorder %v607_v41, 0.0  ;;  %v611_v42 = vmul.f32 0.01, %v607_v41  ;;  %v612_v43 = vsel %vm608_vm7, %v606_v37, %v610_v40 }
 0x1ce   : > { %v613_v44 = vsel %vm609_vm8, %v607_v41, %v611_v42 }
 0x1cf   : > { %v614_v45 = vpack.c.bf16 %v613_v44, %v612_v43 }
 0x1d1   : > { %919 = vmatmul.mubr.msk.bf16.vlgmr.msra.gmra.mrb[4].mxu1 %vm646_vm9, %v614_v45 }
 0x2a4   : > { %v684_v49 = vpop.f32.mrb[4].mxu1 }
 0x2a5   : > { %v685_v50 = vadd.f32 %v867_v48, %v684_v49  ;;  %v920_v51 = vpop.f32.mrb[5].mxu1 }
 0x2a6   : > { %v687_v52 = vpop.f32.mrb[6].mxu1 }
 0x2a7   : > { %v693_v53 = vmul.f32 0.01, %v685_v50  ;;  %v688_v54 = vadd.f32 %v867_v48, %v687_v52  ;;  %v921_v55 = vpop.f32.mrb[7].mxu1  ;;  %vm691_vm10 = vcmp.ge.f32.partialorder %v685_v50, 0.0 }
 0x2a9   : > { %vm692_vm11 = vcmp.ge.f32.partialorder %v688_v54, 0.0  ;;  %v694_v56 = vmul.f32 0.01, %v688_v54  ;;  %v695_v57 = vsel %vm691_vm10, %v685_v50, %v693_v53 }
 0x2ab   : > { %v696_v58 = vsel %vm692_vm11, %v688_v54, %v694_v56 }
 0x2ac   : > { %v697_v59 = vpack.c.bf16 %v696_v58, %v695_v57 }
 0x2ae   : > { %927 = vmatmul.mubr.msk.bf16.vlgmr.msra.gmra.mrb[8].mxu0 %vm554_vm6, %v697_v59 }
 0x381   : > { %v758_v61 = vpop.f32.mrb[8].mxu0 }
 0x382   : > { %v759_v62 = vadd.f32 %v872_v60, %v758_v61  ;;  %v928_v63 = vpop.f32.mrb[9].mxu0 }
 0x383   : > { %v761_v0 = vpop.f32.mrb[10].mxu0 }
 0x384   : > { %v765_v1 = vsub.f32 0.0, %v759_v62  ;;  %v762_v2 = vadd.f32 %v872_v60, %v761_v0  ;;  %v929_v3 = vpop.f32.mrb[11].mxu0 }
 0x386   : > { %v767_v4 = vmul.f32 1.442695, %v765_v1  ;;  %v766_v5 = vsub.f32 0.0, %v762_v2 }
 0x388   : > { %948 = vpow2.f32 %v767_v4  ;;  %v769_v6 = vmul.f32 1.442695, %v766_v5 }
 0x38a   : > { %950 = vpow2.f32 %v769_v6 }
 0x392   : > { %v949_v7 = vpop.eup %948 }
 0x393   : > { %v771_v8 = vadd.f32 1.0, %v949_v7 }
 0x394   : > { %v951_v9 = vpop.eup %950 }
 0x395   : > { %952 = vrcp.f32 %v771_v8  ;;  %v772_v10 = vadd.f32 1.0, %v951_v9 }
 0x397   : > { %954 = vrcp.f32 %v772_v10 }
 0x39f   : > { %v953_v11 = vpop.eup %952 }
 0x3a0   : > { %778 = vst.msk [vmem:[%s412_s17] sm:$0xff] %vm777_vm12, %v953_v11 }
 0x3a1   : > { %v955_v12 = vpop.eup %954 }
 0x3a2   : > { %779 = vst.msk [vmem:[%s412_s17 + $0x8] sm:$0xff] %vm777_vm12, %v955_v12 }
 0x3a3 PF: > { %s23_s19 = sadd.s32 1, %s962_s19  }
 0x3a4   : > { %p20_p4 = scmp.ge.s32.totalorder %s23_s19, 4  }
 0x3a6   :  { %22 = sbr.rel (!%p20_p4) target bundleno = 3 (0x3), region = 97 }

</bundles_post_ra>
